<compile_context>
chip_gen: v5e
topology: v5e:2x2
jax: 0.10.0
libtpu: 0.0.40
codegen_flags: <defaults>
</compile_context>

<pallas_src>
import functools

import jax
import jax.numpy as jnp
from jax.experimental import pallas as pl
from jax.experimental.pallas import tpu as pltpu


def _round_up(x, m):
    return ((x + m - 1) // m) * m


def ce_ls_kernel(x_ref, t_ref, loss_ref, *, ls):
    """One grid step: (TB, C) logits + (TB, 1) labels -> (TB, 1) per-row loss.

    loss_i = lse_i - ls * x[i, t_i] - (1 - ls)/C * sum_j x[i, j]
    """
    x = x_ref[...]                      # streaming dtype (f32 or bf16)
    t = t_ref[...]                      # (TB, 1) int32
    TB, C = x.shape
    f32 = jnp.float32

    # True-class logit via masked lane reduction. (1, C) iota broadcasts
    # against the (TB, 1) labels — no full-tile int32 iota. The select and the
    # sum stay in the streaming dtype (exact: all-but-one addend is zero).
    cls_idx = jax.lax.broadcasted_iota(jnp.int32, (1, C), 1)
    x_t = jnp.sum(jnp.where(cls_idx == t, x, 0),
                  axis=-1, keepdims=True).astype(f32)

    # Uniform-smoothing term: row sum of the raw logits. For sub-f32 inputs
    # ride the otherwise-idle MXU with f32 accumulation; keep the exact VPU
    # sum for f32 inputs.
    if x.dtype == jnp.float32:
        sum_x = jnp.sum(x, axis=-1, keepdims=True)
    else:
        ones = jnp.ones((C, 1), dtype=x.dtype)
        sum_x = jnp.dot(x, ones, preferred_element_type=f32)

    # Numerically stable logsumexp: max/sub in the streaming dtype, exp-sum
    # and log in f32 (EUP).
    m = jnp.max(x, axis=-1, keepdims=True)
    e = jnp.exp((x - m).astype(f32))
    lse = jnp.log(jnp.sum(e, axis=-1, keepdims=True)) + m.astype(f32)

    loss_ref[...] = lse - ls * x_t - ((1.0 - ls) / C) * sum_x


def cross_entropy_label_smoothing(x, target, ls_=0.9, block_b=None):
    """x: (B, C) float logits (f32 or bf16), target: (B,) int labels.

    Returns the scalar mean smoothed cross-entropy (f32).
    NOTE: out-of-range labels contribute x_t = 0 (one_hot semantics), unlike
    torch's gather-based CE which would error.
    """
    B, C = x.shape
    itemsize = jnp.dtype(x.dtype).itemsize

    # Per-generation budgets (trace-time query; fall back to the smallest
    # VMEM part if the query is unavailable).
    try:
        vmem_cap = int(pltpu.get_tpu_info().vmem_capacity_bytes)
    except Exception:
        vmem_cap = 64 << 20
    if vmem_cap >= (100 << 20):          # 128 MiB parts: v5e / v6e
        target_f32_tile = 16 << 20
        vmem_cap_limit = 96 << 20
    else:                                # 64 MiB parts: v7x
        target_f32_tile = 8 << 20
        vmem_cap_limit = 48 << 20

    if block_b is None:
        # Size the batch tile off the f32-equivalent working set.
        rows = max(8, (target_f32_tile // max(C * 4, 1)) // 8 * 8)
        # Keep >= 2 grid tiles so the "parallel" batch axis can shard across
        # both TensorCores on v7x (harmless on single-TC v5e/v6e).
        rows = min(rows, max(8, _round_up((B + 1) // 2, 8)))
        block_b = int(min(rows, _round_up(B, 8)))
    block_b = max(8, (block_b // 8) * 8)

    num_tiles = pl.cdiv(B, block_b)      # ragged last tile handled in-kernel

    # VMEM budget: double-buffered native-dtype input tiles + ~3 full-tile f32
    # temporaries (upcast / exp / mask) + slack, clamped per generation.
    tile_native = block_b * C * itemsize
    tile_f32 = block_b * C * 4
    vmem_limit = int(min(max(2 * tile_native + 3 * tile_f32 + (2 << 20),
                             16 << 20), vmem_cap_limit))

    t2 = target.astype(jnp.int32).reshape(B, 1)
    kernel = functools.partial(ce_ls_kernel, ls=float(ls_))

    per_row = pl.pallas_call(
        kernel,
        out_shape=jax.ShapeDtypeStruct((B, 1), jnp.float32),
        grid_spec=pltpu.PrefetchScalarGridSpec(
            num_scalar_prefetch=0,
            grid=(num_tiles,),
            in_specs=[
                pl.BlockSpec((block_b, C), lambda i: (i, 0)),  # logits tile
                pl.BlockSpec((block_b, 1), lambda i: (i, 0)),  # labels tile
            ],
            out_specs=pl.BlockSpec((block_b, 1), lambda i: (i, 0)),
        ),
        compiler_params=pltpu.CompilerParams(
            dimension_semantics=("parallel",),  # independent per-tile losses
            vmem_limit_bytes=vmem_limit,
        ),
    )(x, t2)

    return jnp.mean(per_row)


def _reference(x, target, n_dim, ls_=0.9):
    tgt = jax.nn.one_hot(target, n_dim, dtype=jnp.float32)
    tgt = tgt * ls_ + (1.0 - ls_) / n_dim
    logprobs = jax.nn.log_softmax(x.astype(jnp.float32), axis=-1)
    return jnp.mean(jnp.sum(-logprobs * tgt, axis=-1))


if __name__ == "__main__":
    ls_ = 0.9
    key = jax.random.PRNGKey(0)

    # case 1: small aligned batch, f32 (module's self.n_dim = C)
    B, C = 8, 32
    kx, kt, key = jax.random.split(key, 3)
    x = jax.random.normal(kx, (B, C), dtype=jnp.float32)
    target = jax.random.randint(kt, (B,), 0, C, dtype=jnp.int32)
    loss = jax.block_until_ready(cross_entropy_label_smoothing(x, target, ls_=ls_))
    ref = _reference(x, target, C, ls_)
    assert jnp.allclose(loss, ref, atol=1e-5, rtol=1e-5), (loss, ref)

    # case 2: non-multiple-of-tile batch (exercises the no-pad ragged path)
    B2 = 10
    kx, kt, key = jax.random.split(key, 3)
    x2 = jax.random.normal(kx, (B2, C), dtype=jnp.float32)
    t2 = jax.random.randint(kt, (B2,), 0, C, dtype=jnp.int32)
    loss2 = jax.block_until_ready(cross_entropy_label_smoothing(x2, t2, ls_=ls_))
    ref2 = _reference(x2, t2, C, ls_)
    assert jnp.allclose(loss2, ref2, atol=1e-5, rtol=1e-5), (loss2, ref2)

    # case 3: bf16 logits stream (half the HBM bytes, bf16 VALU + MXU sum path)
    x3 = x.astype(jnp.bfloat16)
    loss3 = jax.block_until_ready(cross_entropy_label_smoothing(x3, target, ls_=ls_))
    ref3 = _reference(x3, target, C, ls_)
    assert jnp.allclose(loss3, ref3, atol=2e-2, rtol=2e-2), (loss3, ref3)

    print("KERNEL_OK")
</pallas_src>

<mosaic_0001>
module attributes {stable_mosaic.version = 11 : i64} {
  func.func @ce_ls_kernel(%arg0: i32, %arg1: memref<8x32xf32, #tpu.memory_space<vmem>>, %arg2: memref<8x1xi32, #tpu.memory_space<vmem>>, %arg3: memref<8x1xf32, #tpu.memory_space<vmem>>) attributes {dimension_semantics = [#tpu.dimension_semantics<parallel>], iteration_bounds = array<i64: 1>, scalar_prefetch = 0 : i64, scratch_operands = 0 : i64, tpu.core_type = #tpu.core_type<tc>, window_params = [{transform_indices = @transform_0, window_bounds = array<i64: 8, 32>}, {transform_indices = @transform_1, window_bounds = array<i64: 8, 1>}, {transform_indices = @transform_2, window_bounds = array<i64: 8, 1>}]} {
    %c0 = arith.constant 0 : index
    %c0_0 = arith.constant 0 : index
    %0 = vector.load %arg1[%c0, %c0_0] : memref<8x32xf32, #tpu.memory_space<vmem>>, vector<8x32xf32>
    %c0_1 = arith.constant 0 : index
    %c0_2 = arith.constant 0 : index
    %1 = vector.load %arg2[%c0_1, %c0_2] : memref<8x1xi32, #tpu.memory_space<vmem>>, vector<8x1xi32>
    %2 = tpu.iota {dimensions = array<i32: 1>} : vector<1x32xi32>
    %3 = vector.broadcast %2 : vector<1x32xi32> to vector<8x32xi32>
    %4 = vector.broadcast %1 : vector<8x1xi32> to vector<8x32xi32>
    %5 = arith.cmpi eq, %3, %4 : vector<8x32xi32>
    %c0_i32 = arith.constant 0 : i32
    %6 = arith.sitofp %c0_i32 : i32 to f32
    %7 = vector.broadcast %6 : f32 to vector<8x32xf32>
    %8 = arith.select %5, %0, %7 : vector<8x32xi1>, vector<8x32xf32>
    %cst = arith.constant dense<0.000000e+00> : vector<8xf32>
    %9 = vector.multi_reduction <add>, %8, %cst [1] : vector<8x32xf32> to vector<8xf32>
    %10 = vector.shape_cast %9 : vector<8xf32> to vector<8x1xf32>
    %cst_3 = arith.constant dense<0.000000e+00> : vector<8xf32>
    %11 = vector.multi_reduction <add>, %0, %cst_3 [1] : vector<8x32xf32> to vector<8xf32>
    %12 = vector.shape_cast %11 : vector<8xf32> to vector<8x1xf32>
    %cst_4 = arith.constant dense<0xFF800000> : vector<8xf32>
    %13 = vector.multi_reduction <maximumf>, %0, %cst_4 [1] : vector<8x32xf32> to vector<8xf32>
    %14 = vector.shape_cast %13 : vector<8xf32> to vector<8x1xf32>
    %15 = vector.broadcast %14 : vector<8x1xf32> to vector<8x32xf32>
    %16 = arith.subf %0, %15 : vector<8x32xf32>
    %17 = math.exp %16 : vector<8x32xf32>
    %cst_5 = arith.constant dense<0.000000e+00> : vector<8xf32>
    %18 = vector.multi_reduction <add>, %17, %cst_5 [1] : vector<8x32xf32> to vector<8xf32>
    %19 = vector.shape_cast %18 : vector<8xf32> to vector<8x1xf32>
    %20 = math.log %19 : vector<8x1xf32>
    %21 = arith.addf %20, %14 : vector<8x1xf32>
    %cst_6 = arith.constant 0.899999976 : f32
    %22 = vector.broadcast %cst_6 : f32 to vector<8x1xf32>
    %23 = arith.mulf %22, %10 : vector<8x1xf32>
    %24 = arith.subf %21, %23 : vector<8x1xf32>
    %cst_7 = arith.constant 3.125000e-03 : f32
    %25 = vector.broadcast %cst_7 : f32 to vector<8x1xf32>
    %26 = arith.mulf %25, %12 : vector<8x1xf32>
    %27 = arith.subf %24, %26 : vector<8x1xf32>
    %c0_8 = arith.constant 0 : index
    %c0_9 = arith.constant 0 : index
    %28 = vector.load %arg3[%c0_8, %c0_9] : memref<8x1xf32, #tpu.memory_space<vmem>>, vector<8x1xf32>
    tpu.vector_store %arg3[%c0_8, %c0_9], %27 {strides = array<i32>} : memref<8x1xf32, #tpu.memory_space<vmem>>, vector<8x1xf32>,
    return
  }
  func.func @transform_0(%arg0: i32) -> (i32, i32) {
    %c0_i32 = arith.constant 0 : i32
    %c0_i32_0 = arith.constant 0 : i32
    return %arg0, %c0_i32 : i32, i32
  }
  func.func @transform_1(%arg0: i32) -> (i32, i32) {
    %c0_i32 = arith.constant 0 : i32
    %c0_i32_0 = arith.constant 0 : i32
    return %arg0, %c0_i32 : i32, i32
  }
  func.func @transform_2(%arg0: i32) -> (i32, i32) {
    %c0_i32 = arith.constant 0 : i32
    %c0_i32_0 = arith.constant 0 : i32
    return %arg0, %c0_i32 : i32, i32
  }
}

</mosaic_0001>

<bundles_post_ra>
// kernel: tpu_custom_call.1
= control target key start
LH: loop header
LB: loop body
LE: loop exit
PB: predicated region body
PF: predicated region fallthrough
CT: control target
= control target key end

     0   :  { %vm20_vm0 = vcmask 261120   ;;  %v55_v1 = vmov 0   ;;  %v13_v10 = vlaneseq  ;;  %vm43_vm2 = vcmask 7168   ;;  %s84_s0 = inlined_call_operand.vmem [shape: f32[8,32], index: 0, kind: input, shape index: {}]   ;;  %s85_s1 = inlined_call_operand.vmem [shape: s32[8,1], index: 1, kind: input, shape index: {}]   ;;  %s86_s2 = inlined_call_operand.vmem [shape: f32[8,1], index: 2, kind: output, shape index: {}]  }
   0x1   :  { %v11_v0 = vld [vmem:[%s84_s0] sm:$0xff]  ;;  %50 = vset.pattern.permute.xlu0 %v55_v1 }
   0x2   :  { %v27_v2 = vsel %vm20_vm0, %v11_v0, -inf  ;;  %v12_v3 = vld [vmem:[%s85_s1] sm:$0xff]  ;;  %v24_v4 = vsel %vm20_vm0, %v11_v0, 0.0  ;;  %v14_v11 = vand.u32 127, %v13_v10 }
   0x3   :  { %28 = vmax.xlane.f32.xlu0 %v27_v2  ;;  %25 = vadd.xlane.f32.xlu2 %v24_v4 }
  0x17   :  { %16 = vperm.xlu0 %50, %v12_v3  }
  0x76   :  { %v29_v5 = vpop.xlane.xlu0 %28  ;;  %v26_v18 = vpop.xlane.xlu2 %25 }
  0x77   :  { %v30_v6 = vsub.f32 %v11_v0, %v29_v5  ;;  %v41_v22 = vmul.f32 0.003125, %v26_v18 }
  0x79   :  { %v31_v7 = vmul.f32 1.442695, %v30_v6 }
  0x7b   :  { %51 = vpow2.f32 %v31_v7 }
  0x81   :  { %v52_v8 = vpop.eup %51 }
  0x82   :  { %v33_v9 = vsel %vm20_vm0, %v52_v8, 0.0 }
  0x83   :  { %34 = vadd.xlane.f32.xlu1 %v33_v9 }
  0x89   :  { %v17_v12 = vpop.permute.xlu0 %16 }
  0x8a   :  { %vm18_vm1 = vcmp.eq.s32.totalorder %v14_v11, %v17_v12 }
  0x8b   :  { %v19_v13 = vsel %vm18_vm1, %v11_v0, 0.0 }
  0x8c   :  { %v21_v14 = vsel %vm20_vm0, %v19_v13, 0.0 }
  0x8d   :  { %22 = vadd.xlane.f32.xlu1 %v21_v14 }
  0xf6   :  { %v35_v15 = vpop.xlane.xlu1 %34 }
  0xf7   :  { %53 = vlog2.f32 %v35_v15 }
  0xfd   :  { %v54_v16 = vpop.eup %53 }
  0xfe   :  { %v37_v17 = vmul.f32 0.6931472, %v54_v16 }
 0x100   :  { %v38_v19 = vadd.f32 %v37_v17, %v29_v5  ;;  %v23_v20 = vpop.xlane.xlu1 %22 }
 0x101   :  { %v39_v21 = vmul.f32 0.9, %v23_v20 }
 0x103   :  { %v40_v23 = vsub.f32 %v38_v19, %v39_v21 }
 0x105   :  { %v42_v24 = vsub.f32 %v40_v23, %v41_v22 }
 0x107   :  { %44 = vst.msk [vmem:[%s86_s2] sm:$0xff] %vm43_vm2, %v42_v24 }

</bundles_post_ra>
